<compile_context>
chip_gen: v5e
topology: v5e:2x2
jax: 0.10.0
libtpu: 0.0.40
codegen_flags: <defaults>
</compile_context>

<pallas_src>
import jax
import jax.numpy as jnp
from jax.experimental import pallas as pl
from jax.experimental.pallas import tpu as pltpu


# ~3 MiB per tile buffer: 2 x (in + out) x 3 MiB ~= 12 MiB pipeline footprint.
_TARGET_TILE_BYTES = 3 * 1024 * 1024


def _scale_kernel(scale_ref, x_ref, o_ref):
    # scale_ref: (1, 1) float32 in SMEM; x_ref / o_ref: (tile_r, lanes) VMEM.
    s = scale_ref[0, 0]
    x = x_ref[...]
    if o_ref.dtype == jnp.float32:
        o_ref[...] = x * s
    elif jnp.issubdtype(o_ref.dtype, jnp.floating):
        # Native-dtype multiply (bf16/f16 VPU on v6e/v7x): cast the scalar
        # once instead of promoting every element to f32.
        o_ref[...] = x * s.astype(o_ref.dtype)
    else:
        # Integer inputs (not the real Scale use case): compute in f32, round.
        o_ref[...] = jnp.round(x.astype(jnp.float32) * s).astype(o_ref.dtype)


def _round_up(x: int, m: int) -> int:
    return ((x + m - 1) // m) * m


def _sublane_multiple(dtype) -> int:
    # 8 sublanes of 32-bit; packed dtypes need 16 (2 B) / 32 (1 B) rows.
    itemsize = jnp.dtype(dtype).itemsize
    return max(8, 32 // max(itemsize, 1))


def _row_dim_semantics():
    """CORE_PARALLEL on multi-TensorCore chips (v7x); 'parallel' elsewhere."""
    try:
        kind = jax.devices()[0].device_kind.lower()
    except Exception:
        kind = ""
    if "v7" in kind:
        return (getattr(pltpu, "CORE_PARALLEL", "parallel"),)
    return ("parallel",)


def scale_forward(x: jax.Array, scale: jax.Array) -> jax.Array:
    """Apply y = x * scale with a streamed, lane-dense Pallas TPU kernel."""
    orig_shape = x.shape
    orig_dtype = x.dtype
    total = x.size
    if total == 0:
        return x

    itemsize = jnp.dtype(orig_dtype).itemsize
    sub = _sublane_multiple(orig_dtype)

    # Widest lane count (multiple of 128) dividing the element count: in this
    # (common) case there is no padding and no output slice.
    lanes = next((c for c in (2048, 1024, 512, 256, 128) if total % c == 0), None)

    x_flat = x.reshape(-1)
    if lanes is None:
        # TODO(synk): misaligned tail still costs one pad copy + one slice copy;
        # real Scale inputs (conv feature maps) are virtually always 128-aligned.
        lanes = 128
        padded_total = _round_up(total, lanes)
        x_flat = jnp.pad(x_flat, (0, padded_total - total))
    else:
        padded_total = total

    rows = padded_total // lanes
    x2d = x_flat.reshape(rows, lanes)

    # Byte-based tile sizing, rounded to the dtype's sublane packing.
    target_rows = max(sub, (_TARGET_TILE_BYTES // (lanes * itemsize)) // sub * sub)
    if rows <= target_rows:
        tile_r = rows            # one block == full row extent (always legal)
    else:
        tile_r = target_rows     # last block may be partial; Pallas masks it
    grid = (pl.cdiv(rows, tile_r),)

    # Scalar stays 32-bit in SMEM; cast (if any) happens once inside the kernel.
    scale_arr = jnp.asarray(scale, dtype=jnp.float32).reshape(1, 1)

    out = pl.pallas_call(
        _scale_kernel,
        out_shape=jax.ShapeDtypeStruct((rows, lanes), orig_dtype),
        grid=grid,
        in_specs=[
            pl.BlockSpec(memory_space=pltpu.SMEM),             # scalar scale
            pl.BlockSpec((tile_r, lanes), lambda i: (i, 0)),   # streamed input
        ],
        out_specs=pl.BlockSpec((tile_r, lanes), lambda i: (i, 0)),
        compiler_params=pltpu.CompilerParams(
            dimension_semantics=_row_dim_semantics(),
        ),
        cost_estimate=pl.CostEstimate(
            flops=total,
            transcendentals=0,
            bytes_accessed=2 * padded_total * itemsize,
        ),
    )(scale_arr, x2d)

    if padded_total != total:
        out = out.reshape(-1)[:total]
    return out.reshape(orig_shape)


if __name__ == "__main__":
    key = jax.random.PRNGKey(0)
    # NCHW input, matching typical conv-feature input to Scale.
    x = jax.random.normal(key, (2, 4, 16, 16), dtype=jnp.float32)

    # Non-trivial scale value so the multiply is actually exercised
    # (Scale() default init is 1.0).
    scale_param = jnp.array(0.5, dtype=jnp.float32)

    y = scale_forward(x, scale_param)
    y = jax.block_until_ready(y)

    # Verify against plain-JAX reference (exact semantics of x * scale).
    y_ref = x * scale_param
    assert y.shape == x.shape and y.dtype == x.dtype
    assert jnp.allclose(y, y_ref), "mismatch vs reference"

    print("KERNEL_OK")
</pallas_src>

<mosaic_0001>
module attributes {stable_mosaic.version = 11 : i64} {
  func.func @_scale_kernel(%arg0: i32, %arg1: memref<1x1xf32, #tpu.memory_space<smem>>, %arg2: memref<1x2048xf32, #tpu.memory_space<vmem>>, %arg3: memref<1x2048xf32, #tpu.memory_space<vmem>>) attributes {dimension_semantics = [#tpu.dimension_semantics<parallel>], iteration_bounds = array<i64: 1>, scalar_prefetch = 0 : i64, scratch_operands = 0 : i64, tpu.core_type = #tpu.core_type<tc>, window_params = [{transform_indices = @transform_0, window_bounds = array<i64: 1, 1>}, {transform_indices = @transform_1, window_bounds = array<i64: 1, 2048>}, {transform_indices = @transform_2, window_bounds = array<i64: 1, 2048>}]} {
    %c0 = arith.constant 0 : index
    %c0_0 = arith.constant 0 : index
    %0 = memref.load %arg1[%c0, %c0_0] : memref<1x1xf32, #tpu.memory_space<smem>>
    %c0_1 = arith.constant 0 : index
    %c0_2 = arith.constant 0 : index
    %1 = vector.load %arg2[%c0_1, %c0_2] : memref<1x2048xf32, #tpu.memory_space<vmem>>, vector<1x2048xf32>
    %2 = vector.broadcast %0 : f32 to vector<1x2048xf32>
    %3 = arith.mulf %1, %2 : vector<1x2048xf32>
    %c0_3 = arith.constant 0 : index
    %c0_4 = arith.constant 0 : index
    %4 = vector.load %arg3[%c0_3, %c0_4] : memref<1x2048xf32, #tpu.memory_space<vmem>>, vector<1x2048xf32>
    tpu.vector_store %arg3[%c0_3, %c0_4], %3 {strides = array<i32>} : memref<1x2048xf32, #tpu.memory_space<vmem>>, vector<1x2048xf32>,
    return
  }
  func.func @transform_0(%arg0: i32) -> (i32, i32) {
    %c0_i32 = arith.constant 0 : i32
    %c0_i32_0 = arith.constant 0 : i32
    %c0_i32_1 = arith.constant 0 : i32
    return %c0_i32, %c0_i32_0 : i32, i32
  }
  func.func @transform_1(%arg0: i32) -> (i32, i32) {
    %c0_i32 = arith.constant 0 : i32
    %c0_i32_0 = arith.constant 0 : i32
    return %arg0, %c0_i32 : i32, i32
  }
  func.func @transform_2(%arg0: i32) -> (i32, i32) {
    %c0_i32 = arith.constant 0 : i32
    %c0_i32_0 = arith.constant 0 : i32
    return %arg0, %c0_i32 : i32, i32
  }
}

</mosaic_0001>

<bundles_post_ra>
// kernel: tpu_custom_call.1
= control target key start
LH: loop header
LB: loop body
LE: loop exit
PB: predicated region body
PF: predicated region fallthrough
CT: control target
= control target key end

     0   :  { %8 = vsyncpa [#allocation4], 0  ;;  %s132_s0 = inlined_call_operand.<no memory space> [shape: f32[1,1], index: 0, kind: input, shape index: {}]   ;;  %s133_s1 = inlined_call_operand.hbm [shape: f32[1,2048], index: 1, kind: input, shape index: {}]   ;;  %s134_s2 = inlined_call_operand.hbm [shape: f32[1,2048], index: 2, kind: output, shape index: {}]  }
   0x1   :  { %9 = vsyncpa [#allocation5], 0  ;;  %s17_s11 = sshll.u32 %s133_s1, 4  ;;  %s106_s12 = smov [#allocation3]   ;;  %s18_s11 = int_to_ptr.hbm [resolvable:$true] %s17_s11 }
   0x2   :  { %s19_s13 = sshll.u32 %s106_s12, 4  ;;  %s20_s13 = int_to_ptr.vmem [resolvable:$true] %s19_s13 }
   0x3   :  { %22 = dma.hbm_to_vmem [thread:$0]  %s18_s11, 256, %s20_s13, [#allocation4]  }
   0x4   :  { %102 = dma.done.wait [#allocation4], 256  }
   0x5   :  { %103 = vsyncadd [#allocation4], 4294967040  ;;  %v30_v0 = vstv %s132_s0  ;;  %s107_s16 = smov [#allocation6]   ;;  %s42_s20 = sshll.u32 %s134_s2, 4  ;;  %v28_v1 = vld [vmem:[#allocation3] sm:$0xff]  ;;  %v29_v2 = vld [vmem:[#allocation3 + $0x8] sm:$0xff]  ;;  %s43_s20 = int_to_ptr.hbm [resolvable:$true] %s42_s20 }
   0x6   :  { %s40_s17 = sshll.u32 %s107_s16, 4  ;;  %v31_v3 = vmul.f32 %v30_v0, %v28_v1  ;;  %v32_v4 = vmul.f32 %v30_v0, %v29_v2  ;;  %s41_s17 = int_to_ptr.vmem [resolvable:$true] %s40_s17 }
   0x8   :  { %33 = vst [vmem:[#allocation6] sm:$0xff] %v31_v3 }
   0x9   :  { %34 = vst [vmem:[#allocation6 + $0x8] sm:$0xff] %v32_v4 }
   0xa   :  { %45 = dma.vmem_to_hbm [thread:$0]  %s41_s17, 256, %s43_s20, [#allocation5]  }
   0xb   :  { %104 = dma.done.wait [#allocation5], 256  }
   0xc   :  { %105 = vsyncadd [#allocation5], 4294967040 }
   0xd   :  { %50 = vsyncpa [#allocation4], 1 }
   0xe   :  { %51 = vsyncpa [#allocation5], 1 }

</bundles_post_ra>
